<compile_context>
chip_gen: v7x
topology: tpu7x:2x2x1
jax: 0.10.0
libtpu: 0.0.40
codegen_flags: <defaults>
</compile_context>

<pallas_src>
import jax
import jax.numpy as jnp
from jax.experimental import pallas as pl
from jax.experimental.pallas import tpu as pltpu

K = 28 * 28                      # 784 reduction dim for fc1 (kept unpadded; Mosaic handles it)
H1 = 128
H2_RAW, H2_PAD = 64, 128
OUT_RAW, OUT_PAD = 10, 128
TB_MAX = 512                     # max rows per batch tile (safe on v5e's 16 MiB scoped VMEM)
_MIN_ROWS = 8                    # f32 sublane granularity for the batch-tile dim


def _round_up(n, m):
    return ((n + m - 1) // m) * m


def _mlp_kernel(x_ref, w1_ref, b1_ref, w2_ref, b2_ref, w3_ref, b3_ref, o_ref):
    """Fused 3-layer MLP on one (TB, 784) batch tile. bf16 MXU operands, f32 accumulation."""
    x = x_ref[...].astype(jnp.bfloat16)                                     # (TB, 784)

    h1 = jnp.dot(x, w1_ref[...], preferred_element_type=jnp.float32)       # (TB, 128) f32
    h1 = jnp.maximum(h1 + b1_ref[...], 0.0)

    h2 = jnp.dot(h1.astype(jnp.bfloat16), w2_ref[...],
                 preferred_element_type=jnp.float32)                       # (TB, 128) f32
    h2 = jnp.maximum(h2 + b2_ref[...], 0.0)

    out = jnp.dot(h2.astype(jnp.bfloat16), w3_ref[...],
                  preferred_element_type=jnp.float32)                      # (TB, 128) f32
    o_ref[...] = (out + b3_ref[...]).astype(o_ref.dtype)                   # bf16 writeback


def prepare_params(params):
    """One-time layout prep (call once, outside the per-forward jitted path).

    Weights are stored (in, out) so the kernel computes x @ W; biases are accepted
    as (n,) or (1, n) and reshaped defensively. fc2/fc3 are zero-padded to 128-lane
    widths and all weights are pre-cast to bf16.
    """
    w1, b1, w2, b2, w3, b3 = params
    b1 = jnp.asarray(b1, jnp.float32).reshape(1, -1)
    b2 = jnp.asarray(b2, jnp.float32).reshape(1, -1)
    b3 = jnp.asarray(b3, jnp.float32).reshape(1, -1)

    w1_p = jnp.asarray(w1, jnp.bfloat16)                                      # (784, 128)
    w2_p = jnp.zeros((H1, H2_PAD), jnp.bfloat16).at[:, :H2_RAW].set(
        jnp.asarray(w2, jnp.bfloat16))
    w3_p = jnp.zeros((H2_PAD, OUT_PAD), jnp.bfloat16).at[:H2_RAW, :OUT_RAW].set(
        jnp.asarray(w3, jnp.bfloat16))
    b2_p = jnp.zeros((1, H2_PAD), jnp.float32).at[:, :H2_RAW].set(b2)
    b3_p = jnp.zeros((1, OUT_PAD), jnp.float32).at[:, :OUT_RAW].set(b3)
    return (w1_p, b1, w2_p, b2_p, w3_p, b3_p)


@jax.jit
def simple_nn_forward(x, prepared_params):
    """x: (B, 1, 28, 28) float32 (NCHW). Returns logits (B, 10) float32."""
    w1_p, b1_p, w2_p, b2_p, w3_p, b3_p = prepared_params
    batch = x.shape[0]

    # nn.Flatten on NCHW; reshape is free, no pad/cast pre-pass over HBM.
    x_flat = x.reshape(batch, K).astype(jnp.float32)

    # Remainder-aware tile choice; force >=2 grid steps when possible so the
    # "parallel" batch axis shards across both v7x TensorCores.
    n_tiles = pl.cdiv(batch, TB_MAX)
    if batch >= 2 * _MIN_ROWS:
        n_tiles = max(n_tiles, 2)
    tb = _round_up(pl.cdiv(batch, n_tiles), _MIN_ROWS)
    if tb >= batch:
        tb = batch                        # single full-extent block (legal for any batch)
    grid = pl.cdiv(batch, tb)             # edge block may be partial; OOB rows are masked

    const2d = lambda shape: pl.BlockSpec(shape, lambda i: (0, 0))   # VMEM-resident operand

    out = pl.pallas_call(
        _mlp_kernel,
        out_shape=jax.ShapeDtypeStruct((batch, OUT_PAD), jnp.bfloat16),
        grid=(grid,),
        in_specs=[
            pl.BlockSpec((tb, K), lambda i: (i, 0)),   # x tile (streamed, f32)
            const2d((K, H1)),                          # w1
            const2d((1, H1)),                          # b1
            const2d((H1, H2_PAD)),                     # w2
            const2d((1, H2_PAD)),                      # b2
            const2d((H2_PAD, OUT_PAD)),                # w3
            const2d((1, OUT_PAD)),                     # b3
        ],
        out_specs=pl.BlockSpec((tb, OUT_PAD), lambda i: (i, 0)),
        compiler_params=pltpu.CompilerParams(
            dimension_semantics=("parallel",),         # megacore sharding on v7x
        ),
    )(x_flat, w1_p, b1_p, w2_p, b2_p, w3_p, b3_p)

    return out[:, :OUT_RAW].astype(jnp.float32)


def init_params(key):
    """Deterministic init mimicking PyTorch nn.Linear default (U[-1/sqrt(fan_in), +])."""
    def linear(key, fan_in, fan_out):
        kw, kb = jax.random.split(key)
        bound = 1.0 / jnp.sqrt(fan_in)
        # stored as (in, out) so the kernel computes x @ W (== x @ W_pt.T + b in PyTorch)
        w = jax.random.uniform(kw, (fan_in, fan_out), jnp.float32, -bound, bound)
        b = jax.random.uniform(kb, (fan_out,), jnp.float32, -bound, bound)
        return w, b

    k1, k2, k3 = jax.random.split(key, 3)
    w1, b1 = linear(k1, K, H1)
    w2, b2 = linear(k2, H1, H2_RAW)
    w3, b3 = linear(k3, H2_RAW, OUT_RAW)
    return (w1, b1, w2, b2, w3, b3)


def _reference_forward(x, params):
    """Plain-JAX reference with the same numerics (bf16 operands, f32 acc, bf16 writeback)."""
    w1, b1, w2, b2, w3, b3 = params

    def lin(h, w, b):
        return jnp.dot(h.astype(jnp.bfloat16), jnp.asarray(w, jnp.bfloat16),
                       preferred_element_type=jnp.float32) \
               + jnp.asarray(b, jnp.float32).reshape(1, -1)

    h = x.reshape(x.shape[0], -1)
    h = jnp.maximum(lin(h, w1, b1), 0.0)
    h = jnp.maximum(lin(h, w2, b2), 0.0)
    out = lin(h, w3, b3)
    return out.astype(jnp.bfloat16).astype(jnp.float32)   # match kernel's bf16 output path


if __name__ == "__main__":
    key = jax.random.PRNGKey(0)
    k_param, k_x = jax.random.split(key)

    params = init_params(k_param)
    prepared = prepare_params(params)          # one-time weight layout prep

    # Small MNIST-like batch: (B=2, C=1, H=28, W=28), NCHW like PyTorch.
    x = jax.random.normal(k_x, (2, 1, 28, 28), dtype=jnp.float32)

    logits = simple_nn_forward(x, prepared)
    jax.block_until_ready(logits)

    ref = _reference_forward(x, params)
    assert logits.shape == (2, 10), logits.shape
    assert jnp.allclose(logits, ref, atol=2e-2, rtol=2e-2), "mismatch vs reference"

    print("KERNEL_OK")
</pallas_src>

<mosaic_0001>
module attributes {stable_mosaic.version = 11 : i64} {
  func.func @_mlp_kernel(%arg0: i32, %arg1: memref<2x784xf32, #tpu.memory_space<vmem>>, %arg2: memref<784x128xbf16, #tpu.memory_space<vmem>>, %arg3: memref<1x128xf32, #tpu.memory_space<vmem>>, %arg4: memref<128x128xbf16, #tpu.memory_space<vmem>>, %arg5: memref<1x128xf32, #tpu.memory_space<vmem>>, %arg6: memref<128x128xbf16, #tpu.memory_space<vmem>>, %arg7: memref<1x128xf32, #tpu.memory_space<vmem>>, %arg8: memref<2x128xbf16, #tpu.memory_space<vmem>>) attributes {dimension_semantics = [#tpu.dimension_semantics<parallel>], iteration_bounds = array<i64: 1>, scalar_prefetch = 0 : i64, scratch_operands = 0 : i64, tpu.core_type = #tpu.core_type<tc>, window_params = [{transform_indices = @transform_0, window_bounds = array<i64: 2, 784>}, {pipeline_mode = #tpu.pipeline_mode<synchronous>, transform_indices = @transform_1, window_bounds = array<i64: 784, 128>}, {pipeline_mode = #tpu.pipeline_mode<synchronous>, transform_indices = @transform_2, window_bounds = array<i64: 1, 128>}, {pipeline_mode = #tpu.pipeline_mode<synchronous>, transform_indices = @transform_3, window_bounds = array<i64: 128, 128>}, {pipeline_mode = #tpu.pipeline_mode<synchronous>, transform_indices = @transform_4, window_bounds = array<i64: 1, 128>}, {pipeline_mode = #tpu.pipeline_mode<synchronous>, transform_indices = @transform_5, window_bounds = array<i64: 128, 128>}, {pipeline_mode = #tpu.pipeline_mode<synchronous>, transform_indices = @transform_6, window_bounds = array<i64: 1, 128>}, {transform_indices = @transform_7, window_bounds = array<i64: 2, 128>}]} {
    %c0 = arith.constant 0 : index
    %c0_0 = arith.constant 0 : index
    %0 = vector.load %arg1[%c0, %c0_0] : memref<2x784xf32, #tpu.memory_space<vmem>>, vector<2x784xf32>
    %1 = arith.truncf %0 : vector<2x784xf32> to vector<2x784xbf16>
    %c0_1 = arith.constant 0 : index
    %c0_2 = arith.constant 0 : index
    %2 = vector.load %arg2[%c0_1, %c0_2] : memref<784x128xbf16, #tpu.memory_space<vmem>>, vector<784x128xbf16>
    %cst = arith.constant dense<0.000000e+00> : vector<2x128xf32>
    %3 = tpu.matmul %1, %2, %cst {dimension_numbers = #tpu.dot_dimension_numbers<[1], [0], [0], [1], [0, 0, 1, 1], [], []>} : vector<2x784xbf16>, vector<784x128xbf16>, vector<2x128xf32> -> vector<2x128xf32>
    %c0_3 = arith.constant 0 : index
    %c0_4 = arith.constant 0 : index
    %4 = vector.load %arg3[%c0_3, %c0_4] : memref<1x128xf32, #tpu.memory_space<vmem>>, vector<1x128xf32>
    %5 = vector.broadcast %4 : vector<1x128xf32> to vector<2x128xf32>
    %6 = arith.addf %3, %5 : vector<2x128xf32>
    %cst_5 = arith.constant 0.000000e+00 : f32
    %7 = vector.broadcast %cst_5 : f32 to vector<2x128xf32>
    %8 = arith.maximumf %6, %7 : vector<2x128xf32>
    %9 = arith.truncf %8 : vector<2x128xf32> to vector<2x128xbf16>
    %c0_6 = arith.constant 0 : index
    %c0_7 = arith.constant 0 : index
    %10 = vector.load %arg4[%c0_6, %c0_7] : memref<128x128xbf16, #tpu.memory_space<vmem>>, vector<128x128xbf16>
    %cst_8 = arith.constant dense<0.000000e+00> : vector<2x128xf32>
    %11 = tpu.matmul %9, %10, %cst_8 {dimension_numbers = #tpu.dot_dimension_numbers<[1], [0], [0], [1], [0, 0, 1, 1], [], []>} : vector<2x128xbf16>, vector<128x128xbf16>, vector<2x128xf32> -> vector<2x128xf32>
    %c0_9 = arith.constant 0 : index
    %c0_10 = arith.constant 0 : index
    %12 = vector.load %arg5[%c0_9, %c0_10] : memref<1x128xf32, #tpu.memory_space<vmem>>, vector<1x128xf32>
    %13 = vector.broadcast %12 : vector<1x128xf32> to vector<2x128xf32>
    %14 = arith.addf %11, %13 : vector<2x128xf32>
    %cst_11 = arith.constant 0.000000e+00 : f32
    %15 = vector.broadcast %cst_11 : f32 to vector<2x128xf32>
    %16 = arith.maximumf %14, %15 : vector<2x128xf32>
    %17 = arith.truncf %16 : vector<2x128xf32> to vector<2x128xbf16>
    %c0_12 = arith.constant 0 : index
    %c0_13 = arith.constant 0 : index
    %18 = vector.load %arg6[%c0_12, %c0_13] : memref<128x128xbf16, #tpu.memory_space<vmem>>, vector<128x128xbf16>
    %cst_14 = arith.constant dense<0.000000e+00> : vector<2x128xf32>
    %19 = tpu.matmul %17, %18, %cst_14 {dimension_numbers = #tpu.dot_dimension_numbers<[1], [0], [0], [1], [0, 0, 1, 1], [], []>} : vector<2x128xbf16>, vector<128x128xbf16>, vector<2x128xf32> -> vector<2x128xf32>
    %c0_15 = arith.constant 0 : index
    %c0_16 = arith.constant 0 : index
    %20 = vector.load %arg7[%c0_15, %c0_16] : memref<1x128xf32, #tpu.memory_space<vmem>>, vector<1x128xf32>
    %21 = vector.broadcast %20 : vector<1x128xf32> to vector<2x128xf32>
    %22 = arith.addf %19, %21 : vector<2x128xf32>
    %23 = arith.truncf %22 : vector<2x128xf32> to vector<2x128xbf16>
    %c0_17 = arith.constant 0 : index
    %c0_18 = arith.constant 0 : index
    %24 = vector.load %arg8[%c0_17, %c0_18] : memref<2x128xbf16, #tpu.memory_space<vmem>>, vector<2x128xbf16>
    tpu.vector_store %arg8[%c0_17, %c0_18], %23 {strides = array<i32>} : memref<2x128xbf16, #tpu.memory_space<vmem>>, vector<2x128xbf16>,
    return
  }
  func.func @transform_0(%arg0: i32) -> (i32, i32) {
    %c0_i32 = arith.constant 0 : i32
    %c0_i32_0 = arith.constant 0 : i32
    return %arg0, %c0_i32 : i32, i32
  }
  func.func @transform_1(%arg0: i32) -> (i32, i32) {
    %c0_i32 = arith.constant 0 : i32
    %c0_i32_0 = arith.constant 0 : i32
    %c0_i32_1 = arith.constant 0 : i32
    return %c0_i32, %c0_i32_0 : i32, i32
  }
  func.func @transform_2(%arg0: i32) -> (i32, i32) {
    %c0_i32 = arith.constant 0 : i32
    %c0_i32_0 = arith.constant 0 : i32
    %c0_i32_1 = arith.constant 0 : i32
    return %c0_i32, %c0_i32_0 : i32, i32
  }
  func.func @transform_3(%arg0: i32) -> (i32, i32) {
    %c0_i32 = arith.constant 0 : i32
    %c0_i32_0 = arith.constant 0 : i32
    %c0_i32_1 = arith.constant 0 : i32
    return %c0_i32, %c0_i32_0 : i32, i32
  }
  func.func @transform_4(%arg0: i32) -> (i32, i32) {
    %c0_i32 = arith.constant 0 : i32
    %c0_i32_0 = arith.constant 0 : i32
    %c0_i32_1 = arith.constant 0 : i32
    return %c0_i32, %c0_i32_0 : i32, i32
  }
  func.func @transform_5(%arg0: i32) -> (i32, i32) {
    %c0_i32 = arith.constant 0 : i32
    %c0_i32_0 = arith.constant 0 : i32
    %c0_i32_1 = arith.constant 0 : i32
    return %c0_i32, %c0_i32_0 : i32, i32
  }
  func.func @transform_6(%arg0: i32) -> (i32, i32) {
    %c0_i32 = arith.constant 0 : i32
    %c0_i32_0 = arith.constant 0 : i32
    %c0_i32_1 = arith.constant 0 : i32
    return %c0_i32, %c0_i32_0 : i32, i32
  }
  func.func @transform_7(%arg0: i32) -> (i32, i32) {
    %c0_i32 = arith.constant 0 : i32
    %c0_i32_0 = arith.constant 0 : i32
    return %arg0, %c0_i32 : i32, i32
  }
}

</mosaic_0001>

<bundles_post_ra>
// kernel: simple_nn_forward.1
= control target key start
LH: loop header
LB: loop body
LE: loop exit
PB: predicated region body
PF: predicated region fallthrough
CT: control target
= control target key end

     0   :  { %12 = vsyncpa [#allocation3], 0  ;;  %s1186_s24 = smov [#allocation2]   ;;  %s1334_s0 = inlined_call_operand.vmem [shape: f32[2,784], index: 0, kind: input, shape index: {}]   ;;  %s1335_s1 = inlined_call_operand.hbm [shape: bf16[784,128], index: 1, kind: input, shape index: {}]   ;;  %s1336_s2 = inlined_call_operand.vmem [shape: f32[1,128], index: 2, kind: input, shape index: {}]   ;;  %s1337_s3 = inlined_call_operand.vmem [shape: bf16[128,128], index: 3, kind: input, shape index: {}]   ;;  %s1338_s4 = inlined_call_operand.vmem [shape: f32[1,128], index: 4, kind: input, shape index: {}]   ;;  %s1339_s5 = inlined_call_operand.vmem [shape: bf16[128,128], index: 5, kind: input, shape index: {}]   ;;  %s1340_s6 = inlined_call_operand.vmem [shape: f32[1,128], index: 6, kind: input, shape index: {}]   ;;  %s1341_s7 = inlined_call_operand.vmem [shape: bf16[2,128], index: 7, kind: output, shape index: {}]  }
   0x1   :  { %s20_s25 = sshll.u32 %s1186_s24, 4  ;;  %s1162_s28 = scalar_lea.hbm %s1335_s1, 6272  ;;  %s21_s25 = int_to_ptr.vmem [resolvable:$true] %s20_s25 }
   0x2   :  { %p1163_p0 = scmp.ne.s32.totalorder %s1335_s1, %s1162_s28  ;;  %p1166_p1 = scmp.lt.u32.totalorder %s1162_s28, %s1335_s1 }
   0x4   :  { %p1168_p2 = pnand %p1166_p1, %p1163_p0 }
   0x6   :  { %1171 = shalt.err (!%p1168_p2)
}
   0x7   :  { %s1172_s10 = scalar_lea.vmem %s21_s25, 6272  ;;  %p1177_p4 = scmp.lt.s32.totalorder %s21_s25, %s21_s25 }
   0x8   :  { %p1173_p3 = scmp.ne.s32.totalorder %s21_s25, %s1172_s10  ;;  %p1178_p5 = scmp.lt.s32.totalorder %s1172_s10, %s1172_s10 }
   0xa   :  { %p1179_p6 = por %p1178_p5, %p1177_p4 }
   0xc   :  { %p1180_p7 = pnand %p1179_p6, %p1173_p3 }
   0xe   :  { %1183 = shalt.err (!%p1180_p7)
}
   0xf   :  { %s1187_s11 = smov 64   ;;  %s1188_s12 = smov 4  }
  0x10   :  { %26 = dma.hbm_to_vmem [thread:$0]  %s1335_s1, 6272, %s21_s25, [#allocation3], %s1187_s11, %s1187_s11, %s1188_s12  }
  0x11   :  { %1184 = dma.done.wait [#allocation3], 6272  }
  0x12   :  { %1185 = vsyncadd [#allocation3], 4294961024  ;;  %v1095_v0 = vld [vmem:[#allocation2 + $0x40] sm:$0xff]   ;;  %v1099_v4 = vld [vmem:[#allocation2 + $0x48] sm:$0xff]   ;;  %v1189_v21 = vmov 1983009808   ;;  %v49_v23 = vlaneseq }
  0x13   :  { %v1096_v1 = vld [vmem:[#allocation2] sm:$0xff]   ;;  %957 = vmatprep.subr.bf16.mxu0 %v1095_v0  ;;  %v1100_v5 = vld [vmem:[#allocation2 + $0x8] sm:$0xff]   ;;  %v1103_v8 = vld [vmem:[#allocation2 + $0x50] sm:$0xff]   ;;  %v47_v22 = vunpack.c.l.s4 %v1189_v21  ;;  %v1190_v45 = vmov 0.0   ;;  %vm1191_vm0 = vmmov 0   ;;  %vm491_vm1 = vcmask 130048  }
  0x14   :  { %v1097_v2 = vld [vmem:[#allocation2 + $0xc0] sm:$0xff]   ;;  %958 = vmatpush3.bf16.msra.mxu0 %v1096_v1  ;;  %v1101_v6 = vld [vmem:[#allocation2 + $0xc8] sm:$0xff]   ;;  %v1104_v9 = vld [vmem:[#allocation2 + $0x10] sm:$0xff]   ;;  %v50_v29 = vshrl.u32 %v49_v23, 7 }
  0x15   :  { %v1098_v3 = vld [vmem:[#allocation2 + $0x80] sm:$0xff]   ;;  %979 = vmatprep.subr.bf16.mxu1 %v1097_v2  ;;  %959 = vmatprep.subr.bf16.mxu0 %v1099_v4  ;;  %v1102_v7 = vld [vmem:[#allocation2 + $0x88] sm:$0xff]   ;;  %v1105_v10 = vld [vmem:[#allocation2 + $0xd0] sm:$0xff]   ;;  %v48_v28 = vunpack.c.0.s8 %v47_v22 }
  0x16   :  { %980 = vmatpush3.bf16.msra.mxu1 %v1098_v3  ;;  %v1106_v11 = vld [vmem:[#allocation2 + $0x90] sm:$0xff]   ;;  %v1107_v12 = vld [vmem:[#allocation2 + $0x58] sm:$0xff]   ;;  %v1111_v16 = vld [vmem:[#allocation2 + $0x60] sm:$0xff]  }
  0x17   :  { %981 = vmatprep.subr.bf16.mxu1 %v1101_v6  ;;  %v1108_v13 = vld [vmem:[#allocation2 + $0x18] sm:$0xff]   ;;  %v1112_v17 = vld [vmem:[#allocation2 + $0x20] sm:$0xff]   ;;  %v1115_v20 = vld [vmem:[#allocation2 + $0x68] sm:$0xff]   ;;  %v51_v34 = vsub.s32 %v48_v28, %v50_v29 }
  0x18   :  { %960 = vmatpush3.bf16.msra.mxu0 %v1100_v5  ;;  %v1109_v14 = vld [vmem:[#allocation2 + $0xd8] sm:$0xff]   ;;  %v1113_v18 = vld [vmem:[#allocation2 + $0xe0] sm:$0xff]   ;;  %v1116_v24 = vld [vmem:[#allocation2 + $0x28] sm:$0xff]  }
  0x19   :  { %961 = vmatprep.subr.bf16.mxu0 %v1103_v8  ;;  %v1110_v15 = vld [vmem:[#allocation2 + $0x98] sm:$0xff]   ;;  %v1114_v19 = vld [vmem:[#allocation2 + $0xa0] sm:$0xff]   ;;  %v1117_v25 = vld [vmem:[#allocation2 + $0xe8] sm:$0xff]  }
  0x1a   :  { %982 = vmatpush3.bf16.msra.mxu1 %v1102_v7  ;;  %v1118_v26 = vld [vmem:[#allocation2 + $0xa8] sm:$0xff]   ;;  %v1119_v27 = vld [vmem:[#allocation2 + $0x70] sm:$0xff]   ;;  %v1123_v33 = vld [vmem:[#allocation2 + $0x78] sm:$0xff]  }
  0x1b   :  { %983 = vmatprep.subr.bf16.mxu1 %v1105_v10  ;;  %v1120_v30 = vld [vmem:[#allocation2 + $0x30] sm:$0xff]   ;;  %v1124_v35 = vld [vmem:[#allocation2 + $0x38] sm:$0xff]   ;;  %v41_v37 = vld [vmem:[%s1334_s0] sm:$0xff] }
  0x1c   :  { %962 = vmatpush3.bf16.msra.mxu0 %v1104_v9  ;;  %v1121_v31 = vld [vmem:[#allocation2 + $0xf0] sm:$0xff]   ;;  %v1125_v36 = vld [vmem:[#allocation2 + $0xf8] sm:$0xff]   ;;  %v52_v38 = vrot.slane %v41_v37, %v51_v34  ;;  %v45_v40 = vcombine.high %v41_v37, %v41_v37  ;;  %v1127_v41 = vld [vmem:[#allocation2 + $0x140] sm:$0xff]  }
  0x1d   :  { %963 = vmatprep.subr.bf16.mxu0 %v1107_v12  ;;  %v1122_v32 = vld [vmem:[#allocation2 + $0xb0] sm:$0xff]   ;;  %v1126_v39 = vld [vmem:[#allocation2 + $0xb8] sm:$0xff]   ;;  %v1129_v48 = vld [vmem:[#allocation2 + $0x100] sm:$0xff]  }
  0x1e   :  { %984 = vmatpush3.bf16.msra.mxu1 %v1106_v11  ;;  %v60_v42 = vcombine.high %v52_v38, %v52_v38  ;;  %v59_v43 = vrot.slane %v45_v40, %v51_v34  ;;  %v85_v44 = vpack.c.bf16 %v52_v38, %v52_v38  ;;  %v1130_v50 = vld [vmem:[#allocation2 + $0x148] sm:$0xff]   ;;  %v1132_v53 = vld [vmem:[#allocation2 + $0x150] sm:$0xff]   ;;  %v1134_v55 = vld [vmem:[#allocation2 + $0x158] sm:$0xff]  }
  0x1f   :  { %985 = vmatprep.subr.bf16.mxu1 %v1109_v14  ;;  %v1131_v52 = vld [vmem:[#allocation2 + $0x108] sm:$0xff]   ;;  %v1133_v54 = vld [vmem:[#allocation2 + $0x110] sm:$0xff]   ;;  %v1135_v56 = vld [vmem:[#allocation2 + $0x118] sm:$0xff]  }
  0x20   :  { %964 = vmatpush3.bf16.msra.mxu0 %v1108_v13  ;;  %v86_v46 = vpack.c.bf16 %v60_v42, %v60_v42  ;;  %v61_v47 = vcombine.high %v59_v43, %v59_v43  ;;  %v87_v49 = vpack.c.bf16 %v59_v43, %v59_v43  ;;  %v1136_v57 = vld [vmem:[#allocation2 + $0x160] sm:$0xff]   ;;  %v42_v59 = vld [vmem:[%s1334_s0 + $0x8] sm:$0x3f]  ;;  %v1140_v5 = vld [vmem:[#allocation2 + $0x170] sm:$0xff]  }
  0x21   :  { %965 = vmatprep.subr.bf16.mxu0 %v1111_v16  ;;  %v1144_v58 = vld [vmem:[#allocation2 + $0x180] sm:$0xff]   ;;  %v62_v61 = vcombine.high %v42_v59, %v42_v59  ;;  %v69_v62 = vrot.slane %v42_v59, %v51_v34  ;;  %v1138_v63 = vld [vmem:[#allocation2 + $0x168] sm:$0xff]   ;;  %v1141_v6 = vld [vmem:[#allocation2 + $0x130] sm:$0xff]  }
  0x22   :  { %986 = vmatpush3.bf16.msra.mxu1 %v1110_v15  ;;  %527 = vmatprep.mubr.bf16.mxu0 %v86_v46  ;;  %v88_v51 = vpack.c.bf16 %v61_v47, %v61_v47  ;;  %v1137_v60 = vld [vmem:[#allocation2 + $0x120] sm:$0xff]   ;;  %v1139_v2 = vld [vmem:[#allocation2 + $0x128] sm:$0xff]   ;;  %v1142_v7 = vld [vmem:[#allocation2 + $0x178] sm:$0xff]  }
  0x23   :  { %987 = vmatprep.subr.bf16.mxu1 %v1113_v18  ;;  %v76_v0 = vrot.slane %v62_v61, %v51_v34  ;;  %v77_v1 = vcombine.high %v69_v62, %v69_v62  ;;  %v1143_v8 = vld [vmem:[#allocation2 + $0x138] sm:$0xff]   ;;  %v89_v9 = vpack.c.bf16 %v69_v62, %v69_v62  ;;  %v1146_v10 = vld [vmem:[%s1337_s3] sm:$0xff]   ;;  %v1147_v11 = vld [vmem:[%s1337_s3 + $0x8] sm:$0xff]  }
  0x24   :  { %966 = vmatpush3.bf16.msra.mxu0 %v1112_v17  ;;  %567 = vmatprep.mubr.bf16.mxu1 %v88_v51  ;;  %v1148_v12 = vld [vmem:[%s1337_s3 + $0x10] sm:$0xff]   ;;  %v1149_v13 = vld [vmem:[%s1337_s3 + $0x18] sm:$0xff]   ;;  %v1150_v14 = vld [vmem:[%s1337_s3 + $0x20] sm:$0xff]  }
  0x25   :  { %967 = vmatprep.subr.bf16.mxu0 %v1115_v20  ;;  %v90_v3 = vpack.c.bf16 %v77_v1, %v77_v1  ;;  %v91_v4 = vpack.c.bf16 %v76_v0, %v76_v0  ;;  %v1151_v15 = vld [vmem:[%s1337_s3 + $0x28] sm:$0xff]   ;;  %v1152_v16 = vld [vmem:[%s1337_s3 + $0x30] sm:$0xff]   ;;  %v1153_v17 = vld [vmem:[%s1337_s3 + $0x38] sm:$0xff]  }
  0x26   :  { %988 = vmatpush3.bf16.msra.mxu1 %v1114_v19  ;;  %v1154_v18 = vld [vmem:[%s1339_s5] sm:$0xff]   ;;  %v1155_v19 = vld [vmem:[%s1339_s5 + $0x8] sm:$0xff]   ;;  %v1156_v20 = vld [vmem:[%s1339_s5 + $0x10] sm:$0xff]  }
  0x27   :  { %989 = vmatprep.subr.bf16.mxu1 %v1117_v25  ;;  %v1157_v21 = vld [vmem:[%s1339_s5 + $0x18] sm:$0xff]   ;;  %v1158_v22 = vld [vmem:[%s1339_s5 + $0x20] sm:$0xff]   ;;  %v1159_v23 = vld [vmem:[%s1339_s5 + $0x28] sm:$0xff]  }
  0x28   :  { %968 = vmatpush3.bf16.msra.mxu0 %v1116_v24  ;;  %v888_v25 = vld [vmem:[%s1336_s2] ss:$0 sm:$0xff]  ;;  %v1160_v51 = vld [vmem:[%s1339_s5 + $0x30] sm:$0xff]  }
  0x29   :  { %969 = vmatprep.subr.bf16.mxu0 %v1119_v27 }
  0x2a   :  { %990 = vmatpush3.bf16.msra.mxu1 %v1118_v26 }
  0x2b   :  { %991 = vmatprep.subr.bf16.mxu1 %v1121_v31 }
  0x2c   :  { %970 = vmatpush3.bf16.msra.mxu0 %v1120_v30 }
  0x2d   :  { %971 = vmatprep.subr.bf16.mxu0 %v1123_v33 }
  0x2e   :  { %992 = vmatpush3.bf16.msra.mxu1 %v1122_v32 }
  0x2f   :  { %993 = vmatprep.subr.bf16.mxu1 %v1125_v36 }
  0x30   :  { %972 = vmatpush3.bf16.msra.mxu0 %v1124_v35 }
  0x31   :  { %1001 = vmatprep.subr.bf16.mxu0 %v1127_v41 }
  0x32   :  { %994 = vmatpush3.bf16.msra.mxu1 %v1126_v39 }
  0x33   :  { %1043 = vmatprep.subr.bf16.mxu1 %v1190_v45  ;;  %528 = vmatmul.mubr.bf16.vlgmr.msra.gmra.mrb[0].mxu0 %v85_v44 }
  0x34   :  { %1002 = vmatpush3.bf16.msra.mxu0 %v1129_v48  ;;  %607 = vmatprep.mubr.bf16.mxu0 %v90_v3 }
  0x35   :  { %568 = vmatmul.mubr.bf16.vlgmr.msra.gmra.mrb[0].mxu1 %v87_v49  ;;  %1003 = vmatprep.subr.bf16.mxu0 %v1130_v50 }
  0x36   :  { %1045 = vmatprep.mubr.msk.bf16.mxu1 %vm1191_vm0, %v1190_v45  ;;  %1044 = vmatpush3.bf16.msra.mxu1 %v1144_v58 }
  0x37   :  { %1049 = vmatprep.subr.bf16.mxu1 %v1190_v45 }
  0x38   :  { %1004 = vmatpush3.bf16.msra.mxu0 %v1131_v52  ;;  %v1161_v52 = vld [vmem:[%s1339_s5 + $0x38] sm:$0xff]  }
  0x39   :  { %1005 = vmatprep.subr.bf16.mxu0 %v1132_v53  ;;  %v939_v53 = vld [vmem:[%s1338_s4] ss:$0 sm:$0xff] }
  0x3c   :  { %1006 = vmatpush3.bf16.msra.mxu0 %v1133_v54 }
  0x3d   :  { %1007 = vmatprep.subr.bf16.mxu0 %v1134_v55  ;;  %1046 = vmatmul.mubr.msk.bf16.vlgmr.msra.gmra.mrb[4].mxu1 %vm491_vm1, %v91_v4 }
  0x3e   :  { %1065 = vmatprep.mubr.msk.bf16.mxu1 %vm1191_vm0, %v1190_v45  ;;  %1050 = vmatpush3.bf16.msra.mxu1 %v1146_v10 }
  0x3f   :  { %1051 = vmatprep.subr.bf16.mxu1 %v1190_v45 }
  0x40   :  { %1008 = vmatpush3.bf16.msra.mxu0 %v1135_v56 }
  0x41   :  { %1009 = vmatprep.subr.bf16.mxu0 %v1136_v57 }
  0x42   :  { %1052 = vmatpush3.bf16.msra.mxu1 %v1147_v11 }
  0x43   :  { %1053 = vmatprep.subr.bf16.mxu1 %v1190_v45 }
  0x44   :  { %1010 = vmatpush3.bf16.msra.mxu0 %v1137_v60 }
  0x45   :  { %1011 = vmatprep.subr.bf16.mxu0 %v1138_v63 }
  0x46   :  { %1054 = vmatpush3.bf16.msra.mxu1 %v1148_v12 }
  0x47   :  { %1055 = vmatprep.subr.bf16.mxu1 %v1190_v45 }
  0x48   :  { %1012 = vmatpush3.bf16.msra.mxu0 %v1139_v2 }
  0x49   :  { %1013 = vmatprep.subr.bf16.mxu0 %v1140_v5 }
  0x4a   :  { %1056 = vmatpush3.bf16.msra.mxu1 %v1149_v13 }
  0x4b   :  { %1057 = vmatprep.subr.bf16.mxu1 %v1190_v45 }
  0x4c   :  { %1014 = vmatpush3.bf16.msra.mxu0 %v1141_v6 }
  0x4d   :  { %1015 = vmatprep.subr.bf16.mxu0 %v1142_v7 }
  0x4e   :  { %1058 = vmatpush3.bf16.msra.mxu1 %v1150_v14 }
  0x4f   :  { %1059 = vmatprep.subr.bf16.mxu1 %v1190_v45 }
  0x50   :  { %1016 = vmatpush3.bf16.msra.mxu0 %v1143_v8 }
  0x51   :  { %1069 = vmatprep.subr.bf16.mxu0 %v1190_v45 }
  0x52   :  { %1060 = vmatpush3.bf16.msra.mxu1 %v1151_v15 }
  0x53   :  { %608 = vmatmul.mubr.bf16.vlgmr.msra.gmra.mrb[4].mxu0 %v89_v9  ;;  %1061 = vmatprep.subr.bf16.mxu1 %v1190_v45 }
  0x54   :  { %1085 = vmatprep.mubr.msk.bf16.mxu0 %vm1191_vm0, %v1190_v45  ;;  %1070 = vmatpush3.bf16.msra.mxu0 %v1154_v18 }
  0x55   :  { %1071 = vmatprep.subr.bf16.mxu0 %v1190_v45 }
  0x56   :  { %1062 = vmatpush3.bf16.msra.mxu1 %v1152_v16 }
  0x57   :  { %1063 = vmatprep.subr.bf16.mxu1 %v1190_v45 }
  0x58   :  { %1072 = vmatpush3.bf16.msra.mxu0 %v1155_v19 }
  0x59   :  { %1073 = vmatprep.subr.bf16.mxu0 %v1190_v45 }
  0x5a   :  { %1064 = vmatpush3.bf16.msra.mxu1 %v1153_v17 }
  0x5c   :  { %1074 = vmatpush3.bf16.msra.mxu0 %v1156_v20 }
  0x5d   :  { %1075 = vmatprep.subr.bf16.mxu0 %v1190_v45 }
  0x60   :  { %1076 = vmatpush3.bf16.msra.mxu0 %v1157_v21 }
  0x61   :  { %1077 = vmatprep.subr.bf16.mxu0 %v1190_v45 }
  0x64   :  { %1078 = vmatpush3.bf16.msra.mxu0 %v1158_v22 }
  0x65   :  { %1079 = vmatprep.subr.bf16.mxu0 %v1190_v45 }
  0x68   :  { %1080 = vmatpush3.bf16.msra.mxu0 %v1159_v23 }
  0x69   :  { %1081 = vmatprep.subr.bf16.mxu0 %v1190_v45 }
  0x6c   :  { %1082 = vmatpush3.bf16.msra.mxu0 %v1160_v51 }
  0x6d   :  { %1083 = vmatprep.subr.bf16.mxu0 %v1190_v45  ;;  %v948_v45 = vld [vmem:[%s1340_s6] ss:$0 sm:$0xff] }
  0x70   :  { %1084 = vmatpush3.bf16.msra.mxu0 %v1161_v52 }
 0x106   :  { %v973_v24 = vpop.f32.mrb[0].mxu0 }
 0x107   :  { %v974_v26 = vpop.f32.mrb[1].mxu0 }
 0x108   :  { %v975_v27 = vadd.f32 %v974_v26, %v973_v24  ;;  %v976_v28 = vpop.f32.mrb[2].mxu0  ;;  %v995_v29 = vpop.f32.mrb[0].mxu1 }
 0x109   :  { %v977_v30 = vpop.f32.mrb[3].mxu0  ;;  %v996_v31 = vpop.f32.mrb[1].mxu1 }
 0x10a   :  { %v530_v32 = vadd.f32 %v975_v27, %v888_v25  ;;  %v997_v33 = vadd.f32 %v996_v31, %v995_v29  ;;  %v998_v34 = vpop.f32.mrb[2].mxu1 }
 0x10b   :  { %v999_v35 = vpop.f32.mrb[3].mxu1 }
 0x10c   :  { %v570_v36 = vadd.f32 %v997_v33, %v530_v32 }
 0x110   :  { %v649_v37 = vpop.f32.mrb[4].mxu1 }
 0x111   :  { %v1047_v38 = vpop.f32.mrb[5].mxu1 }
 0x112   :  { %v652_v39 = vpop.f32.mrb[6].mxu1 }
 0x113   :  { %v1048_v40 = vpop.f32.mrb[7].mxu1 }
 0x126   :  { %v1017_v41 = vpop.f32.mrb[4].mxu0 }
 0x127   :  { %v1018_v42 = vpop.f32.mrb[5].mxu0 }
 0x128   :  { %v1019_v43 = vadd.f32 %v1018_v42, %v1017_v41  ;;  %v1020_v44 = vpop.f32.mrb[6].mxu0 }
 0x129   :  { %v1021_v46 = vpop.f32.mrb[7].mxu0 }
 0x12a   :  { %v610_v47 = vadd.f32 %v1019_v43, %v570_v36 }
 0x12c   :  { %v650_v48 = vadd.f32 %v649_v37, %v610_v47 }
 0x12e   :  { %v655_v49 = vmax.f32 %v650_v48, 0.0 }
 0x130   :  { %v656_v50 = vpack.c.bf16 %v655_v49, %v655_v49 }
 0x132   :  { %1066 = vmatmul.mubr.bf16.vlgmr.msra.gmra.mrb[8].mxu1 %v656_v50 }
 0x205   :  { %v762_v54 = vpop.f32.mrb[8].mxu1 }
 0x206   :  { %v763_v55 = vadd.f32 %v939_v53, %v762_v54  ;;  %v1067_v56 = vpop.f32.mrb[9].mxu1 }
 0x207   :  { %v765_v57 = vpop.f32.mrb[10].mxu1 }
 0x208   :  { %v768_v58 = vmax.f32 %v763_v55, 0.0  ;;  %v1068_v59 = vpop.f32.mrb[11].mxu1 }
 0x20a   :  { %v769_v60 = vpack.c.bf16 %v768_v58, %v768_v58 }
 0x20c   :  { %1086 = vmatmul.mubr.bf16.vlgmr.msra.gmra.mrb[8].mxu0 %v769_v60 }
 0x2df   :  { %v875_v61 = vpop.f32.mrb[8].mxu0 }
 0x2e0   :  { %v876_v62 = vadd.f32 %v948_v45, %v875_v61  ;;  %v1087_v63 = vpop.f32.mrb[9].mxu0 }
 0x2e1   :  { %v878_v0 = vpop.f32.mrb[10].mxu0 }
 0x2e2   :  { %v881_v1 = vpack.c.bf16 %v876_v62, %v876_v62  ;;  %v1088_v2 = vpop.f32.mrb[11].mxu0 }
 0x2e4   :  { %882 = vst [vmem:[%s1341_s7] sm:$0x1] %v881_v1 }
 0x2e5   :  { %887 = vsyncpa [#allocation3], 1 }

</bundles_post_ra>
